<compile_context>
chip_gen: v7x
topology: tpu7x:2x2x1
jax: 0.10.0
libtpu: 0.0.40
codegen_flags: <defaults>
</compile_context>

<pallas_src>
import jax
import jax.numpy as jnp
from jax.experimental import pallas as pl
from jax.experimental.pallas import tpu as pltpu

IN_DIM = 33
H1, H2, H3, H4 = 128, 256, 512, 256
OUT_DIM = 13
OUT_PAD = 128  # lane-dense output width (13 padded up to 128, sliced in wrapper)


def mlp_kernel(x_ref,
               w1_ref, b1_ref,
               w2_ref, b2_ref,
               w3_ref, b3_ref,
               w4_ref, b4_ref,
               w5_ref, b5_ref,
               o_ref):
    # Whole hot path (5 matmuls + bias + ReLU) fused on-chip.
    # bf16 into the MXU, f32 accumulation, elementwise bias/ReLU in f32.
    h = x_ref[...].astype(jnp.bfloat16)
    h = jnp.maximum(
        jnp.dot(h, w1_ref[...], preferred_element_type=jnp.float32) + b1_ref[...], 0.0)
    h = jnp.maximum(
        jnp.dot(h.astype(jnp.bfloat16), w2_ref[...],
                preferred_element_type=jnp.float32) + b2_ref[...], 0.0)
    h = jnp.maximum(
        jnp.dot(h.astype(jnp.bfloat16), w3_ref[...],
                preferred_element_type=jnp.float32) + b3_ref[...], 0.0)
    h = jnp.maximum(
        jnp.dot(h.astype(jnp.bfloat16), w4_ref[...],
                preferred_element_type=jnp.float32) + b4_ref[...], 0.0)
    y = jnp.dot(h.astype(jnp.bfloat16), w5_ref[...],
                preferred_element_type=jnp.float32) + b5_ref[...]
    o_ref[...] = y  # (tile_b, OUT_PAD) f32, lane-dense store


def _prepare_params(params):
    """bf16 weights (MXU operands), f32 biases; fc5 padded 13 -> 128 out cols."""
    w5 = jnp.pad(params["w5"], ((0, 0), (0, OUT_PAD - OUT_DIM)))
    b5 = jnp.pad(params["b5"], ((0, 0), (0, OUT_PAD - OUT_DIM)))
    layers = [
        (params["w1"], params["b1"]),
        (params["w2"], params["b2"]),
        (params["w3"], params["b3"]),
        (params["w4"], params["b4"]),
        (w5, b5),
    ]
    flat = []
    for w, b in layers:
        flat.append(w.astype(jnp.bfloat16))
        flat.append(b.astype(jnp.float32))
    return flat


def mlp_forward(x, params, *, tile_b=None):
    """x: (B, 33) float32. params: dict of w1..w5 (in,out) f32 and b1..b5 (1,out) f32."""
    B = x.shape[0]
    if tile_b is None:
        # Big batch tile (256 on v6e/v7x MXU rows, still a 128-multiple for v5e
        # when B is large); small batches round up to the next multiple of 8.
        tile_b = int(min(256, max(8, pl.next_power_of_2(B))))
    assert tile_b % 8 == 0

    n_blocks = pl.cdiv(B, tile_b)
    B_pad = n_blocks * tile_b
    if B_pad != B:
        x = jnp.pad(x, ((0, B_pad - B), (0, 0)))

    # Weights / biases: single resident VMEM copy, no pipelining/double-buffering.
    resident = pl.BlockSpec(memory_space=pltpu.MemorySpace.VMEM)

    in_specs = [pl.BlockSpec((tile_b, IN_DIM), lambda i: (i, 0))] + [resident] * 10
    out_spec = pl.BlockSpec((tile_b, OUT_PAD), lambda i: (i, 0))

    # Advisory cost estimate for XLA's scheduler.
    mac = IN_DIM * H1 + H1 * H2 + H2 * H3 + H3 * H4 + H4 * OUT_PAD
    flops = 2 * B_pad * mac
    bytes_accessed = (2 * mac                               # bf16 weights
                      + 4 * (H1 + H2 + H3 + H4 + OUT_PAD)    # f32 biases
                      + 4 * B_pad * (IN_DIM + OUT_PAD))      # x in + y out (f32)

    out = pl.pallas_call(
        mlp_kernel,
        out_shape=jax.ShapeDtypeStruct((B_pad, OUT_PAD), jnp.float32),
        grid_spec=pltpu.PrefetchScalarGridSpec(
            num_scalar_prefetch=0,
            grid=(n_blocks,),
            in_specs=in_specs,
            out_specs=out_spec,
        ),
        compiler_params=pltpu.CompilerParams(
            # Batch axis is embarrassingly parallel; with >= 2 grid steps both
            # TensorCores on v7x get work.
            dimension_semantics=("parallel",)),
        cost_estimate=pl.CostEstimate(
            flops=flops, transcendentals=0, bytes_accessed=bytes_accessed),
    )(x, *_prepare_params(params))

    return out[:B, :OUT_DIM]


def init_params(key):
    """Deterministic init mimicking torch.nn.Linear default U(-1/sqrt(fan_in), +1/sqrt(fan_in))."""
    dims = [(IN_DIM, H1), (H1, H2), (H2, H3), (H3, H4), (H4, OUT_DIM)]
    params = {}
    keys = jax.random.split(key, 2 * len(dims))
    for idx, (fan_in, fan_out) in enumerate(dims):
        bound = 1.0 / (fan_in ** 0.5)
        wk, bk = keys[2 * idx], keys[2 * idx + 1]
        params[f"w{idx+1}"] = jax.random.uniform(
            wk, (fan_in, fan_out), jnp.float32, -bound, bound)
        params[f"b{idx+1}"] = jax.random.uniform(
            bk, (1, fan_out), jnp.float32, -bound, bound)
    return params


def reference_forward(x, params):
    """Pure-f32 JAX reference matching the PyTorch module."""
    h = x
    for i in range(1, 5):
        h = jnp.maximum(h @ params[f"w{i}"] + params[f"b{i}"], 0.0)
    return h @ params["w5"] + params["b5"]


if __name__ == "__main__":
    key = jax.random.PRNGKey(0)
    pkey, xkey = jax.random.split(key)
    params = init_params(pkey)

    # Small deterministic test batch (power-of-two path).
    B = 16
    x = jax.random.normal(xkey, (B, IN_DIM), dtype=jnp.float32)
    out = jax.block_until_ready(mlp_forward(x, params))
    ref = reference_forward(x, params)
    assert out.shape == (B, OUT_DIM)
    # bf16 MXU operands with f32 accumulation -> loose tolerance vs f32 reference.
    assert jnp.allclose(out, ref, atol=5e-2, rtol=5e-2), float(jnp.max(jnp.abs(out - ref)))

    # Exercise the non-divisible-batch padding path.
    B2 = 50
    x2 = jax.random.normal(jax.random.PRNGKey(7), (B2, IN_DIM), dtype=jnp.float32)
    out2 = jax.block_until_ready(mlp_forward(x2, params))
    ref2 = reference_forward(x2, params)
    assert out2.shape == (B2, OUT_DIM)
    assert jnp.allclose(out2, ref2, atol=5e-2, rtol=5e-2), float(jnp.max(jnp.abs(out2 - ref2)))

    print("KERNEL_OK")
</pallas_src>

<mosaic_0001>
module attributes {stable_mosaic.version = 11 : i64} {
  func.func @mlp_kernel(%arg0: i32, %arg1: memref<16x33xf32, #tpu.memory_space<vmem>>, %arg2: memref<33x128xbf16, #tpu.memory_space<vmem>>, %arg3: memref<1x128xf32, #tpu.memory_space<vmem>>, %arg4: memref<128x256xbf16, #tpu.memory_space<vmem>>, %arg5: memref<1x256xf32, #tpu.memory_space<vmem>>, %arg6: memref<256x512xbf16, #tpu.memory_space<vmem>>, %arg7: memref<1x512xf32, #tpu.memory_space<vmem>>, %arg8: memref<512x256xbf16, #tpu.memory_space<vmem>>, %arg9: memref<1x256xf32, #tpu.memory_space<vmem>>, %arg10: memref<256x128xbf16, #tpu.memory_space<vmem>>, %arg11: memref<1x128xf32, #tpu.memory_space<vmem>>, %arg12: memref<16x128xf32, #tpu.memory_space<vmem>>) attributes {dimension_semantics = [#tpu.dimension_semantics<parallel>], iteration_bounds = array<i64: 1>, scalar_prefetch = 0 : i64, scratch_operands = 0 : i64, tpu.core_type = #tpu.core_type<tc>, window_params = [{transform_indices = @transform_0, window_bounds = array<i64: 16, 33>}, {pipeline_mode = #tpu.pipeline_mode<synchronous>, transform_indices = @transform_1, window_bounds = array<i64: 33, 128>}, {pipeline_mode = #tpu.pipeline_mode<synchronous>, transform_indices = @transform_2, window_bounds = array<i64: 1, 128>}, {pipeline_mode = #tpu.pipeline_mode<synchronous>, transform_indices = @transform_3, window_bounds = array<i64: 128, 256>}, {pipeline_mode = #tpu.pipeline_mode<synchronous>, transform_indices = @transform_4, window_bounds = array<i64: 1, 256>}, {pipeline_mode = #tpu.pipeline_mode<synchronous>, transform_indices = @transform_5, window_bounds = array<i64: 256, 512>}, {pipeline_mode = #tpu.pipeline_mode<synchronous>, transform_indices = @transform_6, window_bounds = array<i64: 1, 512>}, {pipeline_mode = #tpu.pipeline_mode<synchronous>, transform_indices = @transform_7, window_bounds = array<i64: 512, 256>}, {pipeline_mode = #tpu.pipeline_mode<synchronous>, transform_indices = @transform_8, window_bounds = array<i64: 1, 256>}, {pipeline_mode = #tpu.pipeline_mode<synchronous>, transform_indices = @transform_9, window_bounds = array<i64: 256, 128>}, {pipeline_mode = #tpu.pipeline_mode<synchronous>, transform_indices = @transform_10, window_bounds = array<i64: 1, 128>}, {transform_indices = @transform_11, window_bounds = array<i64: 16, 128>}]} {
    %c0 = arith.constant 0 : index
    %c0_0 = arith.constant 0 : index
    %0 = vector.load %arg1[%c0, %c0_0] : memref<16x33xf32, #tpu.memory_space<vmem>>, vector<16x33xf32>
    %1 = arith.truncf %0 : vector<16x33xf32> to vector<16x33xbf16>
    %c0_1 = arith.constant 0 : index
    %c0_2 = arith.constant 0 : index
    %2 = vector.load %arg2[%c0_1, %c0_2] : memref<33x128xbf16, #tpu.memory_space<vmem>>, vector<33x128xbf16>
    %cst = arith.constant dense<0.000000e+00> : vector<16x128xf32>
    %3 = tpu.matmul %1, %2, %cst {dimension_numbers = #tpu.dot_dimension_numbers<[1], [0], [0], [1], [0, 0, 1, 1], [], []>} : vector<16x33xbf16>, vector<33x128xbf16>, vector<16x128xf32> -> vector<16x128xf32>
    %c0_3 = arith.constant 0 : index
    %c0_4 = arith.constant 0 : index
    %4 = vector.load %arg3[%c0_3, %c0_4] : memref<1x128xf32, #tpu.memory_space<vmem>>, vector<1x128xf32>
    %5 = vector.broadcast %4 : vector<1x128xf32> to vector<16x128xf32>
    %6 = arith.addf %3, %5 : vector<16x128xf32>
    %cst_5 = arith.constant 0.000000e+00 : f32
    %7 = vector.broadcast %cst_5 : f32 to vector<16x128xf32>
    %8 = arith.maximumf %6, %7 : vector<16x128xf32>
    %9 = arith.truncf %8 : vector<16x128xf32> to vector<16x128xbf16>
    %c0_6 = arith.constant 0 : index
    %c0_7 = arith.constant 0 : index
    %10 = vector.load %arg4[%c0_6, %c0_7] : memref<128x256xbf16, #tpu.memory_space<vmem>>, vector<128x256xbf16>
    %cst_8 = arith.constant dense<0.000000e+00> : vector<16x256xf32>
    %11 = tpu.matmul %9, %10, %cst_8 {dimension_numbers = #tpu.dot_dimension_numbers<[1], [0], [0], [1], [0, 0, 1, 1], [], []>} : vector<16x128xbf16>, vector<128x256xbf16>, vector<16x256xf32> -> vector<16x256xf32>
    %c0_9 = arith.constant 0 : index
    %c0_10 = arith.constant 0 : index
    %12 = vector.load %arg5[%c0_9, %c0_10] : memref<1x256xf32, #tpu.memory_space<vmem>>, vector<1x256xf32>
    %13 = vector.broadcast %12 : vector<1x256xf32> to vector<16x256xf32>
    %14 = arith.addf %11, %13 : vector<16x256xf32>
    %cst_11 = arith.constant 0.000000e+00 : f32
    %15 = vector.broadcast %cst_11 : f32 to vector<16x256xf32>
    %16 = arith.maximumf %14, %15 : vector<16x256xf32>
    %17 = arith.truncf %16 : vector<16x256xf32> to vector<16x256xbf16>
    %c0_12 = arith.constant 0 : index
    %c0_13 = arith.constant 0 : index
    %18 = vector.load %arg6[%c0_12, %c0_13] : memref<256x512xbf16, #tpu.memory_space<vmem>>, vector<256x512xbf16>
    %cst_14 = arith.constant dense<0.000000e+00> : vector<16x512xf32>
    %19 = tpu.matmul %17, %18, %cst_14 {dimension_numbers = #tpu.dot_dimension_numbers<[1], [0], [0], [1], [0, 0, 1, 1], [], []>} : vector<16x256xbf16>, vector<256x512xbf16>, vector<16x512xf32> -> vector<16x512xf32>
    %c0_15 = arith.constant 0 : index
    %c0_16 = arith.constant 0 : index
    %20 = vector.load %arg7[%c0_15, %c0_16] : memref<1x512xf32, #tpu.memory_space<vmem>>, vector<1x512xf32>
    %21 = vector.broadcast %20 : vector<1x512xf32> to vector<16x512xf32>
    %22 = arith.addf %19, %21 : vector<16x512xf32>
    %cst_17 = arith.constant 0.000000e+00 : f32
    %23 = vector.broadcast %cst_17 : f32 to vector<16x512xf32>
    %24 = arith.maximumf %22, %23 : vector<16x512xf32>
    %25 = arith.truncf %24 : vector<16x512xf32> to vector<16x512xbf16>
    %c0_18 = arith.constant 0 : index
    %c0_19 = arith.constant 0 : index
    %26 = vector.load %arg8[%c0_18, %c0_19] : memref<512x256xbf16, #tpu.memory_space<vmem>>, vector<512x256xbf16>
    %cst_20 = arith.constant dense<0.000000e+00> : vector<16x256xf32>
    %27 = tpu.matmul %25, %26, %cst_20 {dimension_numbers = #tpu.dot_dimension_numbers<[1], [0], [0], [1], [0, 0, 1, 1], [], []>} : vector<16x512xbf16>, vector<512x256xbf16>, vector<16x256xf32> -> vector<16x256xf32>
    %c0_21 = arith.constant 0 : index
    %c0_22 = arith.constant 0 : index
    %28 = vector.load %arg9[%c0_21, %c0_22] : memref<1x256xf32, #tpu.memory_space<vmem>>, vector<1x256xf32>
    %29 = vector.broadcast %28 : vector<1x256xf32> to vector<16x256xf32>
    %30 = arith.addf %27, %29 : vector<16x256xf32>
    %cst_23 = arith.constant 0.000000e+00 : f32
    %31 = vector.broadcast %cst_23 : f32 to vector<16x256xf32>
    %32 = arith.maximumf %30, %31 : vector<16x256xf32>
    %33 = arith.truncf %32 : vector<16x256xf32> to vector<16x256xbf16>
    %c0_24 = arith.constant 0 : index
    %c0_25 = arith.constant 0 : index
    %34 = vector.load %arg10[%c0_24, %c0_25] : memref<256x128xbf16, #tpu.memory_space<vmem>>, vector<256x128xbf16>
    %cst_26 = arith.constant dense<0.000000e+00> : vector<16x128xf32>
    %35 = tpu.matmul %33, %34, %cst_26 {dimension_numbers = #tpu.dot_dimension_numbers<[1], [0], [0], [1], [0, 0, 1, 1], [], []>} : vector<16x256xbf16>, vector<256x128xbf16>, vector<16x128xf32> -> vector<16x128xf32>
    %c0_27 = arith.constant 0 : index
    %c0_28 = arith.constant 0 : index
    %36 = vector.load %arg11[%c0_27, %c0_28] : memref<1x128xf32, #tpu.memory_space<vmem>>, vector<1x128xf32>
    %37 = vector.broadcast %36 : vector<1x128xf32> to vector<16x128xf32>
    %38 = arith.addf %35, %37 : vector<16x128xf32>
    %c0_29 = arith.constant 0 : index
    %c0_30 = arith.constant 0 : index
    %39 = vector.load %arg12[%c0_29, %c0_30] : memref<16x128xf32, #tpu.memory_space<vmem>>, vector<16x128xf32>
    tpu.vector_store %arg12[%c0_29, %c0_30], %38 {strides = array<i32>} : memref<16x128xf32, #tpu.memory_space<vmem>>, vector<16x128xf32>,
    return
  }
  func.func @transform_0(%arg0: i32) -> (i32, i32) {
    %c0_i32 = arith.constant 0 : i32
    %c0_i32_0 = arith.constant 0 : i32
    return %arg0, %c0_i32 : i32, i32
  }
  func.func @transform_1(%arg0: i32) -> (i32, i32) {
    %c0_i32 = arith.constant 0 : i32
    %c0_i32_0 = arith.constant 0 : i32
    %c0_i32_1 = arith.constant 0 : i32
    return %c0_i32, %c0_i32_0 : i32, i32
  }
  func.func @transform_2(%arg0: i32) -> (i32, i32) {
    %c0_i32 = arith.constant 0 : i32
    %c0_i32_0 = arith.constant 0 : i32
    %c0_i32_1 = arith.constant 0 : i32
    return %c0_i32, %c0_i32_0 : i32, i32
  }
  func.func @transform_3(%arg0: i32) -> (i32, i32) {
    %c0_i32 = arith.constant 0 : i32
    %c0_i32_0 = arith.constant 0 : i32
    %c0_i32_1 = arith.constant 0 : i32
    return %c0_i32, %c0_i32_0 : i32, i32
  }
  func.func @transform_4(%arg0: i32) -> (i32, i32) {
    %c0_i32 = arith.constant 0 : i32
    %c0_i32_0 = arith.constant 0 : i32
    %c0_i32_1 = arith.constant 0 : i32
    return %c0_i32, %c0_i32_0 : i32, i32
  }
  func.func @transform_5(%arg0: i32) -> (i32, i32) {
    %c0_i32 = arith.constant 0 : i32
    %c0_i32_0 = arith.constant 0 : i32
    %c0_i32_1 = arith.constant 0 : i32
    return %c0_i32, %c0_i32_0 : i32, i32
  }
  func.func @transform_6(%arg0: i32) -> (i32, i32) {
    %c0_i32 = arith.constant 0 : i32
    %c0_i32_0 = arith.constant 0 : i32
    %c0_i32_1 = arith.constant 0 : i32
    return %c0_i32, %c0_i32_0 : i32, i32
  }
  func.func @transform_7(%arg0: i32) -> (i32, i32) {
    %c0_i32 = arith.constant 0 : i32
    %c0_i32_0 = arith.constant 0 : i32
    %c0_i32_1 = arith.constant 0 : i32
    return %c0_i32, %c0_i32_0 : i32, i32
  }
  func.func @transform_8(%arg0: i32) -> (i32, i32) {
    %c0_i32 = arith.constant 0 : i32
    %c0_i32_0 = arith.constant 0 : i32
    %c0_i32_1 = arith.constant 0 : i32
    return %c0_i32, %c0_i32_0 : i32, i32
  }
  func.func @transform_9(%arg0: i32) -> (i32, i32) {
    %c0_i32 = arith.constant 0 : i32
    %c0_i32_0 = arith.constant 0 : i32
    %c0_i32_1 = arith.constant 0 : i32
    return %c0_i32, %c0_i32_0 : i32, i32
  }
  func.func @transform_10(%arg0: i32) -> (i32, i32) {
    %c0_i32 = arith.constant 0 : i32
    %c0_i32_0 = arith.constant 0 : i32
    %c0_i32_1 = arith.constant 0 : i32
    return %c0_i32, %c0_i32_0 : i32, i32
  }
  func.func @transform_11(%arg0: i32) -> (i32, i32) {
    %c0_i32 = arith.constant 0 : i32
    %c0_i32_0 = arith.constant 0 : i32
    return %arg0, %c0_i32 : i32, i32
  }
}

</mosaic_0001>

<bundles_post_ra>
// kernel: tpu_custom_call.1
= control target key start
LH: loop header
LB: loop body
LE: loop exit
PB: predicated region body
PF: predicated region fallthrough
CT: control target
= control target key end

     0   :  { %16 = vsyncpa [#allocation3], 0  ;;  %s2390_s0 = inlined_call_operand.hbm [shape: f32[16,33], index: 0, kind: input, shape index: {}]   ;;  %s2391_s1 = inlined_call_operand.hbm [shape: bf16[33,128], index: 1, kind: input, shape index: {}]   ;;  %s2392_s2 = inlined_call_operand.vmem [shape: f32[1,128], index: 2, kind: input, shape index: {}]   ;;  %s2393_s3 = inlined_call_operand.hbm [shape: bf16[128,256], index: 3, kind: input, shape index: {}]   ;;  %s2394_s4 = inlined_call_operand.vmem [shape: f32[1,256], index: 4, kind: input, shape index: {}]   ;;  %s2395_s5 = inlined_call_operand.hbm [shape: bf16[256,512], index: 5, kind: input, shape index: {}]   ;;  %s2396_s6 = inlined_call_operand.vmem [shape: f32[1,512], index: 6, kind: input, shape index: {}]   ;;  %s2397_s7 = inlined_call_operand.hbm [shape: bf16[512,256], index: 7, kind: input, shape index: {}]   ;;  %s2398_s8 = inlined_call_operand.vmem [shape: f32[1,256], index: 8, kind: input, shape index: {}]   ;;  %s2399_s9 = inlined_call_operand.hbm [shape: bf16[256,128], index: 9, kind: input, shape index: {}]   ;;  %s2400_s10 = inlined_call_operand.vmem [shape: f32[1,128], index: 10, kind: input, shape index: {}]   ;;  %s2401_s11 = inlined_call_operand.hbm [shape: f32[16,128], index: 11, kind: output, shape index: {}]  }
   0x1   :  { %17 = vsyncpa [#allocation6], 0 }
   0x2   :  { %18 = vsyncpa [#allocation9], 0 }
   0x3   :  { %19 = vsyncpa [#allocation12], 0 }
   0x4   :  { %20 = vsyncpa [#allocation4], 0  ;;  %s2178_s17 = smov [#allocation5]   ;;  %s2014_s21 = scalar_lea.hbm %s2391_s1, 320 }
   0x5   :  { %s38_s18 = sshll.u32 %s2178_s17, 4  ;;  %p2015_p0 = scmp.ne.s32.totalorder %s2391_s1, %s2014_s21  ;;  %s39_s18 = int_to_ptr.vmem [resolvable:$true] %s38_s18 }
   0x6   :  { %p2018_p1 = scmp.lt.u32.totalorder %s2014_s21, %s2391_s1 }
   0x8   :  { %p2020_p2 = pnand %p2018_p1, %p2015_p0 }
   0xa   :  { %2023 = shalt.err (!%p2020_p2)
}
   0xb   :  { %s2024_s26 = scalar_lea.vmem %s39_s18, 320  ;;  %p2029_p4 = scmp.lt.s32.totalorder %s39_s18, %s39_s18 }
   0xc   :  { %p2025_p3 = scmp.ne.s32.totalorder %s39_s18, %s2024_s26  ;;  %p2030_p5 = scmp.lt.s32.totalorder %s2024_s26, %s2024_s26 }
   0xe   :  { %p2031_p6 = por %p2030_p5, %p2029_p4 }
  0x10   :  { %p2032_p7 = pnand %p2031_p6, %p2025_p3 }
  0x12   :  { %2035 = shalt.err (!%p2032_p7)
}
  0x13   :  { %s2179_s27 = smov 64   ;;  %s2180_s28 = smov 4  }
  0x14   :  { %44 = dma.hbm_to_vmem [thread:$0]  %s2391_s1, 320, %s39_s18, [#allocation6], %s2179_s27, %s2179_s27, %s2180_s28  }
  0x15   :  { %s2181_s12 = smov [#allocation8]   ;;  %s2036_s16 = scalar_lea.hbm %s2395_s5, 8192 }
  0x16   :  { %s66_s13 = sshll.u32 %s2181_s12, 4  ;;  %p2037_p8 = scmp.ne.s32.totalorder %s2395_s5, %s2036_s16  ;;  %s67_s13 = int_to_ptr.vmem [resolvable:$true] %s66_s13 }
  0x17   :  { %p2040_p9 = scmp.lt.u32.totalorder %s2036_s16, %s2395_s5 }
  0x19   :  { %p2042_p10 = pnand %p2040_p9, %p2037_p8 }
  0x1b   :  { %2045 = shalt.err (!%p2042_p10)
}
  0x1c   :  { %s2046_s22 = scalar_lea.vmem %s67_s13, 8192  ;;  %p2051_p12 = scmp.lt.s32.totalorder %s67_s13, %s67_s13 }
  0x1d   :  { %p2047_p11 = scmp.ne.s32.totalorder %s67_s13, %s2046_s22  ;;  %p2052_p13 = scmp.lt.s32.totalorder %s2046_s22, %s2046_s22 }
  0x1f   :  { %p2053_p0 = por %p2052_p13, %p2051_p12 }
  0x21   :  { %p2054_p1 = pnand %p2053_p0, %p2047_p11 }
  0x23   :  { %2057 = shalt.err (!%p2054_p1)
}
  0x24   :  { %s2182_s1 = smov 256   ;;  %s2183_s18 = smov 16  }
  0x25   :  { %72 = dma.hbm_to_vmem [thread:$0]  %s2395_s5, 8192, %s67_s13, [#allocation9], %s2182_s1, %s2182_s1, %s2183_s18  }
  0x26   :  { %s2184_s25 = smov [#allocation2]   ;;  %s2058_s12 = scalar_lea.hbm %s2390_s0, 256 }
  0x27   :  { %s26_s26 = sshll.u32 %s2184_s25, 4  ;;  %p2059_p2 = scmp.ne.s32.totalorder %s2390_s0, %s2058_s12  ;;  %s27_s26 = int_to_ptr.vmem [resolvable:$true] %s26_s26 }
  0x28   :  { %p2062_p3 = scmp.lt.u32.totalorder %s2058_s12, %s2390_s0 }
  0x2a   :  { %p2064_p4 = pnand %p2062_p3, %p2059_p2 }
  0x2c   :  { %2067 = shalt.err (!%p2064_p4)
}
  0x2d   :  { %s2068_s19 = scalar_lea.vmem %s27_s26, 256  ;;  %p2073_p6 = scmp.lt.s32.totalorder %s27_s26, %s27_s26 }
  0x2e   :  { %p2069_p5 = scmp.ne.s32.totalorder %s27_s26, %s2068_s19  ;;  %p2074_p7 = scmp.lt.s32.totalorder %s2068_s19, %s2068_s19 }
  0x30   :  { %p2075_p8 = por %p2074_p7, %p2073_p6 }
  0x32   :  { %p2076_p9 = pnand %p2075_p8, %p2069_p5 }
  0x34   :  { %2079 = shalt.err (!%p2076_p9)
}
  0x35   :  { %s2185_s5 = smov 128   ;;  %s2186_s13 = smov 8  }
  0x36   :  { %32 = dma.hbm_to_vmem [thread:$0]  %s2390_s0, 256, %s27_s26, [#allocation3], %s2185_s5, %s2185_s5, %s2186_s13  }
  0x37   :  { %s2187_s22 = smov [#allocation7]   ;;  %s2188_s18 = smov [#allocation10]  }
  0x38   :  { %s52_s1 = sshll.u32 %s2187_s22, 4  ;;  %s80_s23 = sshll.u32 %s2188_s18, 4  ;;  %s53_s1 = int_to_ptr.vmem [resolvable:$true] %s52_s1  ;;  %s81_s23 = int_to_ptr.vmem [resolvable:$true] %s80_s23 }
  0x39   :  { %s2080_s29 = scalar_lea.hbm %s2393_s3, 2048 }
  0x3a   :  { %p2081_p10 = scmp.ne.s32.totalorder %s2393_s3, %s2080_s29  ;;  %p2084_p11 = scmp.lt.u32.totalorder %s2080_s29, %s2393_s3 }
  0x3c   :  { %p2086_p12 = pnand %p2084_p11, %p2081_p10 }
  0x3e   :  { %2089 = shalt.err (!%p2086_p12)
}
  0x3f   :  { %s2090_s0 = scalar_lea.vmem %s53_s1, 2048  ;;  %p2095_p0 = scmp.lt.s32.totalorder %s53_s1, %s53_s1 }
  0x40   :  { %p2091_p13 = scmp.ne.s32.totalorder %s53_s1, %s2090_s0  ;;  %p2096_p1 = scmp.lt.s32.totalorder %s2090_s0, %s2090_s0 }
  0x42   :  { %p2097_p2 = por %p2096_p1, %p2095_p0 }
  0x44   :  { %p2098_p3 = pnand %p2097_p2, %p2091_p13 }
  0x46   :  { %2101 = shalt.err (!%p2098_p3)
}
  0x47   :  { %58 = dma.hbm_to_vmem [thread:$0]  %s2393_s3, 2048, %s53_s1, [#allocation6], %s2185_s5, %s2185_s5, %s2186_s13  }
  0x48   :  { %s2102_s20 = scalar_lea.hbm %s2397_s7, 8192 }
  0x49   :  { %p2103_p4 = scmp.ne.s32.totalorder %s2397_s7, %s2102_s20  ;;  %p2106_p5 = scmp.lt.u32.totalorder %s2102_s20, %s2397_s7 }
  0x4b   :  { %p2108_p6 = pnand %p2106_p5, %p2103_p4 }
  0x4d   :  { %2111 = shalt.err (!%p2108_p6)
}
  0x4e   :  { %s2112_s25 = scalar_lea.vmem %s81_s23, 8192  ;;  %p2117_p8 = scmp.lt.s32.totalorder %s81_s23, %s81_s23 }
  0x4f   :  { %p2113_p7 = scmp.ne.s32.totalorder %s81_s23, %s2112_s25  ;;  %p2118_p9 = scmp.lt.s32.totalorder %s2112_s25, %s2112_s25 }
  0x51   :  { %p2119_p10 = por %p2118_p9, %p2117_p8 }
  0x53   :  { %p2120_p11 = pnand %p2119_p10, %p2113_p7 }
  0x55   :  { %2123 = shalt.err (!%p2120_p11)
}
  0x56   :  { %86 = dma.hbm_to_vmem [thread:$0]  %s2397_s7, 8192, %s81_s23, [#allocation9], %s2185_s5, %s2185_s5, %s2186_s13  }
  0x57   :  { %s2189_s29 = smov [#allocation11]   ;;  %s2124_s15 = scalar_lea.hbm %s2399_s9, 2048 }
  0x58   :  { %s94_s30 = sshll.u32 %s2189_s29, 4  ;;  %p2125_p12 = scmp.ne.s32.totalorder %s2399_s9, %s2124_s15  ;;  %s95_s30 = int_to_ptr.vmem [resolvable:$true] %s94_s30 }
  0x59   :  { %p2128_p13 = scmp.lt.u32.totalorder %s2124_s15, %s2399_s9 }
  0x5b   :  { %p2130_p0 = pnand %p2128_p13, %p2125_p12 }
  0x5d   :  { %2133 = shalt.err (!%p2130_p0)
}
  0x5e   :  { %s2134_s19 = scalar_lea.vmem %s95_s30, 2048  ;;  %p2139_p2 = scmp.lt.s32.totalorder %s95_s30, %s95_s30 }
  0x5f   :  { %p2135_p1 = scmp.ne.s32.totalorder %s95_s30, %s2134_s19  ;;  %p2140_p3 = scmp.lt.s32.totalorder %s2134_s19, %s2134_s19 }
  0x61   :  { %p2141_p4 = por %p2140_p3, %p2139_p2 }
  0x63   :  { %p2142_p5 = pnand %p2141_p4, %p2135_p1 }
  0x65   :  { %2145 = shalt.err (!%p2142_p5)
}
  0x66   :  { %100 = dma.hbm_to_vmem [thread:$0]  %s2399_s9, 2048, %s95_s30, [#allocation12], %s2179_s27, %s2179_s27, %s2180_s28  }
  0x67   :  { %2168 = dma.done.wait [#allocation3], 256  }
  0x68   :  { %2169 = vsyncadd [#allocation3], 4294967040 }
  0x69   :  { %2170 = dma.done.wait [#allocation6], 2368  }
  0x6a   :  { %2171 = vsyncadd [#allocation6], 4294964928 }
  0x6b   :  { %2172 = dma.done.wait [#allocation9], 16384  }
  0x6c   :  { %2173 = vsyncadd [#allocation9], 4294950912 }
  0x6d   :  { %2174 = dma.done.wait [#allocation12], 2048  }
  0x6e   :  { %2175 = vsyncadd [#allocation12], 4294965248  ;;  %v2190_v0 = vmov 0.0   ;;  %vm2191_vm0 = vmmov 0   ;;  %vm156_vm1 = vcmask 1040384   ;;  %v1779_v1 = vld [vmem:[#allocation5] sm:$0xff]  }
  0x6f   :  { %1745 = vmatprep.subr.bf16.mxu1 %v2190_v0  ;;  %1751 = vmatprep.mubr.msk.bf16.mxu1 %vm2191_vm0, %v2190_v0  ;;  %v1780_v2 = vld [vmem:[#allocation5 + $0x8] sm:$0xff]   ;;  %v1781_v3 = vld [vmem:[#allocation5 + $0x10] ss:$0 sps:$4 sm:$0x11]   ;;  %v2192_v4 = vmov 0   ;;  %v123_v8 = vld [vmem:[#allocation2 + $0x8] sm:$0xff] }
  0x70   :  { %1746 = vmatpush3.bf16.msra.mxu1 %v1779_v1  ;;  %v158_v5 = vsel %vm156_vm1, 65535, %v2192_v4  ;;  %v122_v6 = vld [vmem:[#allocation2] sm:$0xff]  ;;  %v1784_v9 = vld [vmem:[#allocation7 + $0x4] ss:$8 sps:$4 sm:$0xff]   ;;  %vm152_vm2 = vcmask 269312   ;;  %s2193_s18 = smov [#allocation13]  }
  0x71   :  { %1747 = vmatprep.subr.bf16.mxu1 %v2190_v0  ;;  %v160_v7 = vand.u32 %v1781_v3, %v158_v5  ;;  %v124_v10 = vpack.c.bf16 %v123_v8, %v122_v6  ;;  %v1782_v11 = vld [vmem:[#allocation7] ss:$8 sps:$4 sm:$0xff]   ;;  %v1787_v12 = vld [vmem:[#allocation7 + $0x14] ss:$8 sps:$4 sm:$0xff]   ;;  %v1785_v13 = vld [vmem:[#allocation7 + $0x10] ss:$8 sps:$4 sm:$0xff]  }
  0x72   :  { %v1790_v14 = vld [vmem:[#allocation7 + $0x24] ss:$8 sps:$4 sm:$0xff]   ;;  %v1788_v15 = vld [vmem:[#allocation7 + $0x20] ss:$8 sps:$4 sm:$0xff]   ;;  %v1793_v16 = vld [vmem:[#allocation7 + $0x34] ss:$8 sps:$4 sm:$0xff]  }
  0x73   :  { %v1791_v17 = vld [vmem:[#allocation7 + $0x30] ss:$8 sps:$4 sm:$0xff]   ;;  %v1796_v18 = vld [vmem:[#allocation7 + $0x44] ss:$8 sps:$4 sm:$0xff]   ;;  %v1794_v19 = vld [vmem:[#allocation7 + $0x40] ss:$8 sps:$4 sm:$0xff]  }
  0x74   :  { %1748 = vmatpush3.bf16.msra.mxu1 %v1780_v2  ;;  %v1799_v20 = vld [vmem:[#allocation7 + $0x54] ss:$8 sps:$4 sm:$0xff]   ;;  %v1797_v21 = vld [vmem:[#allocation7 + $0x50] ss:$8 sps:$4 sm:$0xff]   ;;  %v1802_v22 = vld [vmem:[#allocation7 + $0x64] ss:$8 sps:$4 sm:$0xff]  }
  0x75   :  { %1749 = vmatprep.subr.bf16.mxu1 %v2190_v0  ;;  %v1800_v23 = vld [vmem:[#allocation7 + $0x60] ss:$8 sps:$4 sm:$0xff]   ;;  %v1805_v24 = vld [vmem:[#allocation7 + $0x74] ss:$8 sps:$4 sm:$0xff]   ;;  %v1803_v25 = vld [vmem:[#allocation7 + $0x70] ss:$8 sps:$4 sm:$0xff]  }
  0x76   :  { %v1806_v26 = vld [vmem:[#allocation8 + $0x4] ss:$16 sps:$4 sm:$0xff]   ;;  %v1810_v27 = vld [vmem:[#allocation8 + $0xc] ss:$16 sps:$4 sm:$0xff]   ;;  %v1811_v28 = vld [vmem:[#allocation8] ss:$16 sps:$4 sm:$0xff]  }
  0x77   :  { %v1812_v29 = vld [vmem:[#allocation8 + $0x24] ss:$16 sps:$4 sm:$0xff]   ;;  %769 = vmatprep.subr.bf16.mxu0 %v1806_v26  ;;  %v1817_v30 = vld [vmem:[#allocation8 + $0x20] ss:$16 sps:$4 sm:$0xff]   ;;  %v1553_v54 = vld [vmem:[%s2392_s2] ss:$0 sm:$0xff] }
  0x78   :  { %1750 = vmatpush3.bf16.msra.mxu1 %v160_v7  ;;  %770 = vmatpush1.bf16.msra.mxu0 %v1811_v28  ;;  %v1818_v31 = vld [vmem:[#allocation8 + $0x44] ss:$16 sps:$4 sm:$0xff]   ;;  %v1823_v32 = vld [vmem:[#allocation8 + $0x40] ss:$16 sps:$4 sm:$0xff]   ;;  %v1808_v63 = vld [vmem:[#allocation8 + $0x8] ss:$16 sps:$4 sm:$0xff]  }
  0x79   :  { %314 = vmatprep.subr.bf16.mxu1 %v1784_v9  ;;  %771 = vmatprep.subr.bf16.mxu0 %v1812_v29  ;;  %v1824_v33 = vld [vmem:[#allocation8 + $0x64] ss:$16 sps:$4 sm:$0xff]   ;;  %v1829_v34 = vld [vmem:[#allocation8 + $0x60] ss:$16 sps:$4 sm:$0xff]   ;;  %v1816_v1 = vld [vmem:[#allocation8 + $0x2c] ss:$16 sps:$4 sm:$0xff]  }
  0x7a   :  { %v1830_v35 = vld [vmem:[#allocation8 + $0x84] ss:$16 sps:$4 sm:$0xff]   ;;  %v1835_v36 = vld [vmem:[#allocation8 + $0x80] ss:$16 sps:$4 sm:$0xff]   ;;  %v1814_v2 = vld [vmem:[#allocation8 + $0x28] ss:$16 sps:$4 sm:$0xff]  }
  0x7b   :  { %1752 = vmatmul.mubr.msk.bf16.vlgmr.msra.gmra.mrb[0].mxu1 %vm152_vm2, %v124_v10  ;;  %v1836_v37 = vld [vmem:[#allocation8 + $0xa4] ss:$16 sps:$4 sm:$0xff]   ;;  %v1841_v38 = vld [vmem:[#allocation8 + $0xa0] ss:$16 sps:$4 sm:$0xff]   ;;  %v1822_v3 = vld [vmem:[#allocation8 + $0x4c] ss:$16 sps:$4 sm:$0xff]  }
  0x7c   :  { %315 = vmatpush1.bf16.msra.mxu1 %v1782_v11  ;;  %346 = vmatprep.mubr.bf16.mxu1 %v2192_v4  ;;  %v1842_v39 = vld [vmem:[#allocation8 + $0xc4] ss:$16 sps:$4 sm:$0xff]   ;;  %v1847_v40 = vld [vmem:[#allocation8 + $0xc0] ss:$16 sps:$4 sm:$0xff]   ;;  %v1820_v4 = vld [vmem:[#allocation8 + $0x48] ss:$16 sps:$4 sm:$0xff]  }
  0x7d   :  { %316 = vmatprep.subr.bf16.mxu1 %v1787_v12  ;;  %772 = vmatpush1.bf16.msra.mxu0 %v1817_v30  ;;  %v1848_v41 = vld [vmem:[#allocation8 + $0xe4] ss:$16 sps:$4 sm:$0xff]   ;;  %v1853_v42 = vld [vmem:[#allocation8 + $0xe0] ss:$16 sps:$4 sm:$0xff]   ;;  %v1828_v5 = vld [vmem:[#allocation8 + $0x6c] ss:$16 sps:$4 sm:$0xff]  }
  0x7e   :  { %773 = vmatprep.subr.bf16.mxu0 %v1818_v31  ;;  %v1854_v43 = vld [vmem:[#allocation8 + $0x104] ss:$16 sps:$4 sm:$0xff]   ;;  %v1859_v44 = vld [vmem:[#allocation8 + $0x100] ss:$16 sps:$4 sm:$0xff]   ;;  %v1826_v6 = vld [vmem:[#allocation8 + $0x68] ss:$16 sps:$4 sm:$0xff]  }
  0x7f   :  { %v1860_v45 = vld [vmem:[#allocation8 + $0x124] ss:$16 sps:$4 sm:$0xff]   ;;  %v1865_v46 = vld [vmem:[#allocation8 + $0x120] ss:$16 sps:$4 sm:$0xff]   ;;  %v1834_v7 = vld [vmem:[#allocation8 + $0x8c] ss:$16 sps:$4 sm:$0xff]  }
  0x80   :  { %317 = vmatpush1.bf16.msra.mxu1 %v1785_v13  ;;  %v1866_v47 = vld [vmem:[#allocation8 + $0x144] ss:$16 sps:$4 sm:$0xff]   ;;  %v1871_v48 = vld [vmem:[#allocation8 + $0x140] ss:$16 sps:$4 sm:$0xff]   ;;  %v1832_v8 = vld [vmem:[#allocation8 + $0x88] ss:$16 sps:$4 sm:$0xff]  }
  0x81   :  { %318 = vmatprep.subr.bf16.mxu1 %v1790_v14  ;;  %774 = vmatpush1.bf16.msra.mxu0 %v1823_v32  ;;  %v1872_v49 = vld [vmem:[#allocation8 + $0x164] ss:$16 sps:$4 sm:$0xff]   ;;  %v1877_v50 = vld [vmem:[#allocation8 + $0x160] ss:$16 sps:$4 sm:$0xff]   ;;  %v1840_v9 = vld [vmem:[#allocation8 + $0xac] ss:$16 sps:$4 sm:$0xff]  }
  0x82   :  { %775 = vmatprep.subr.bf16.mxu0 %v1824_v33  ;;  %v1878_v51 = vld [vmem:[#allocation8 + $0x184] ss:$16 sps:$4 sm:$0xff]   ;;  %v1883_v52 = vld [vmem:[#allocation8 + $0x180] ss:$16 sps:$4 sm:$0xff]   ;;  %v1838_v10 = vld [vmem:[#allocation8 + $0xa8] ss:$16 sps:$4 sm:$0xff]  }
  0x83   :  { %v1884_v53 = vld [vmem:[#allocation8 + $0x1a4] ss:$16 sps:$4 sm:$0xff]   ;;  %v1846_v11 = vld [vmem:[#allocation8 + $0xcc] ss:$16 sps:$4 sm:$0xff]   ;;  %v1844_v12 = vld [vmem:[#allocation8 + $0xc8] ss:$16 sps:$4 sm:$0xff]  }
  0x84   :  { %319 = vmatpush1.bf16.msra.mxu1 %v1788_v15  ;;  %v1852_v13 = vld [vmem:[#allocation8 + $0xec] ss:$16 sps:$4 sm:$0xff]   ;;  %v1850_v14 = vld [vmem:[#allocation8 + $0xe8] ss:$16 sps:$4 sm:$0xff]   ;;  %v1890_v28 = vld [vmem:[#allocation8 + $0x1c4] ss:$16 sps:$4 sm:$0xff]  }
  0x85   :  { %320 = vmatprep.subr.bf16.mxu1 %v1793_v16  ;;  %776 = vmatpush1.bf16.msra.mxu0 %v1829_v34  ;;  %v1858_v15 = vld [vmem:[#allocation8 + $0x10c] ss:$16 sps:$4 sm:$0xff]   ;;  %v1856_v16 = vld [vmem:[#allocation8 + $0x108] ss:$16 sps:$4 sm:$0xff]   ;;  %v1895_v31 = vld [vmem:[#allocation8 + $0x1c0] ss:$16 sps:$4 sm:$0xff]  }
  0x86   :  { %777 = vmatprep.subr.bf16.mxu0 %v1830_v35  ;;  %v1886_v26 = vld [vmem:[#allocation8 + $0x1a8] ss:$16 sps:$4 sm:$0xff]   ;;  %v1894_v29 = vld [vmem:[#allocation8 + $0x1cc] ss:$16 sps:$4 sm:$0xff]   ;;  %v1896_v32 = vld [vmem:[#allocation8 + $0x1e4] ss:$16 sps:$4 sm:$0xff]  }
  0x87   :  { %v1892_v30 = vld [vmem:[#allocation8 + $0x1c8] ss:$16 sps:$4 sm:$0xff]   ;;  %v1900_v33 = vld [vmem:[#allocation8 + $0x1ec] ss:$16 sps:$4 sm:$0xff]   ;;  %v1901_v35 = vld [vmem:[#allocation8 + $0x1e0] ss:$16 sps:$4 sm:$0xff]  }
  0x88   :  { %321 = vmatpush1.bf16.msra.mxu1 %v1791_v17  ;;  %v1864_v17 = vld [vmem:[#allocation8 + $0x12c] ss:$16 sps:$4 sm:$0xff]   ;;  %v1898_v34 = vld [vmem:[#allocation8 + $0x1e8] ss:$16 sps:$4 sm:$0xff]   ;;  %s1538_s24 = sshll.u32 %s2193_s18, 4  ;;  %s1539_s24 = int_to_ptr.vmem [resolvable:$true] %s1538_s24 }
  0x89   :  { %322 = vmatprep.subr.bf16.mxu1 %v1796_v18  ;;  %778 = vmatpush1.bf16.msra.mxu0 %v1835_v36  ;;  %v1862_v18 = vld [vmem:[#allocation8 + $0x128] ss:$16 sps:$4 sm:$0xff]   ;;  %v1904_v36 = vld [vmem:[#allocation10 + $0x4] ss:$8 sps:$4 sm:$0xff]   ;;  %s2146_s25 = scalar_lea.vmem %s1539_s24, 256  ;;  %p2151_p7 = scmp.lt.s32.totalorder %s1539_s24, %s1539_s24 }
  0x8a   :  { %779 = vmatprep.subr.bf16.mxu0 %v1836_v37  ;;  %v224_v37 = vlaneseq  ;;  %p2147_p6 = scmp.ne.s32.totalorder %s1539_s24, %s2146_s25  ;;  %p2152_p8 = scmp.lt.s32.totalorder %s2146_s25, %s2146_s25 }
  0x8c   :  { %323 = vmatpush1.bf16.msra.mxu1 %v1794_v19  ;;  %v1870_v19 = vld [vmem:[#allocation8 + $0x14c] ss:$16 sps:$4 sm:$0xff]   ;;  %p2153_p9 = por %p2152_p8, %p2151_p7 }
  0x8d   :  { %324 = vmatprep.subr.bf16.mxu1 %v1799_v20  ;;  %780 = vmatpush1.bf16.msra.mxu0 %v1841_v38  ;;  %v1868_v20 = vld [vmem:[#allocation8 + $0x148] ss:$16 sps:$4 sm:$0xff]   ;;  %v2344_v38 = vshrl.u32 %v224_v37, 7 }
  0x8e   :  { %781 = vmatprep.subr.bf16.mxu0 %v1842_v39  ;;  %p2154_p10 = pnand %p2153_p9, %p2147_p6 }
  0x8f   :  { %v2347_v39 = vsub.s32 0, %v2344_v38  ;;  %v439_v37 = vsub.s32 2, %v2344_v38 }
  0x90   :  { %325 = vmatpush1.bf16.msra.mxu1 %v1797_v21  ;;  %v1876_v21 = vld [vmem:[#allocation8 + $0x16c] ss:$16 sps:$4 sm:$0xff]  }
  0x91   :  { %326 = vmatprep.subr.bf16.mxu1 %v1802_v22  ;;  %782 = vmatpush1.bf16.msra.mxu0 %v1847_v40  ;;  %v1874_v22 = vld [vmem:[#allocation8 + $0x168] ss:$16 sps:$4 sm:$0xff]   ;;  %v222_v40 = vld [vmem:[%s2394_s4] sm:$0x3] }
  0x92   :  { %783 = vmatprep.subr.bf16.mxu0 %v1848_v41  ;;  %v2353_v41 = vsub.s32 1, %v2344_v38 }
  0x94   :  { %327 = vmatpush1.bf16.msra.mxu1 %v1800_v23  ;;  %v1882_v23 = vld [vmem:[#allocation8 + $0x18c] ss:$16 sps:$4 sm:$0xff]  }
  0x95   :  { %328 = vmatprep.subr.bf16.mxu1 %v1805_v24  ;;  %784 = vmatpush1.bf16.msra.mxu0 %v1853_v42  ;;  %v1880_v24 = vld [vmem:[#allocation8 + $0x188] ss:$16 sps:$4 sm:$0xff]   ;;  %v227_v42 = vrot.slane %v222_v40, %v2347_v39 }
  0x96   :  { %785 = vmatprep.subr.bf16.mxu0 %v1854_v43  ;;  %v231_v43 = vrot.slane %v222_v40, %v2353_v41  ;;  %v427_v40 = vld [vmem:[%s2396_s6] sm:$0xf] }
  0x98   :  { %329 = vmatpush1.bf16.msra.mxu1 %v1803_v25  ;;  %v1888_v25 = vld [vmem:[#allocation8 + $0x1ac] ss:$16 sps:$4 sm:$0xff]  }
  0x99   :  { %812 = vmatprep.subr.bf16.mxu1 %v1810_v27  ;;  %786 = vmatpush1.bf16.msra.mxu0 %v1859_v44  ;;  %v1889_v27 = vld [vmem:[#allocation8 + $0x1a0] ss:$16 sps:$4 sm:$0xff]  }
  0x9a   :  { %787 = vmatprep.subr.bf16.mxu0 %v1860_v45 }
  0x9d   :  { %788 = vmatpush1.bf16.msra.mxu0 %v1865_v46 }
  0x9e   :  { %789 = vmatprep.subr.bf16.mxu0 %v1866_v47 }
  0xa1   :  { %790 = vmatpush1.bf16.msra.mxu0 %v1871_v48 }
  0xa2   :  { %791 = vmatprep.subr.bf16.mxu0 %v1872_v49 }
  0xa5   :  { %792 = vmatpush1.bf16.msra.mxu0 %v1877_v50 }
  0xa6   :  { %793 = vmatprep.subr.bf16.mxu0 %v1878_v51 }
  0xa9   :  { %794 = vmatpush1.bf16.msra.mxu0 %v1883_v52 }
  0xaa   :  { %795 = vmatprep.subr.bf16.mxu0 %v1884_v53 }
  0xad   :  { %796 = vmatpush1.bf16.msra.mxu0 %v1889_v27  ;;  %v1999_v27 = vld [vmem:[#allocation11] sm:$0xff]  }
  0xae   :  { %797 = vmatprep.subr.bf16.mxu0 %v1890_v28  ;;  %v2000_v28 = vld [vmem:[#allocation11 + $0x48] sm:$0xff]  }
  0xb1   :  { %798 = vmatpush1.bf16.msra.mxu0 %v1895_v31  ;;  %v2003_v31 = vld [vmem:[#allocation11 + $0x10] sm:$0xff]  }
  0xb2   :  { %799 = vmatprep.subr.bf16.mxu0 %v1896_v32  ;;  %v2004_v32 = vld [vmem:[#allocation11 + $0x58] sm:$0xff]  }
  0xb5   :  { %800 = vmatpush1.bf16.msra.mxu0 %v1901_v35  ;;  %v2007_v35 = vld [vmem:[#allocation11 + $0x20] sm:$0xff]  }
  0xb6   :  { %1263 = vmatprep.subr.bf16.mxu0 %v1904_v36  ;;  %v2008_v36 = vld [vmem:[#allocation11 + $0x68] sm:$0xff]  }
 0x14e   :  { %v196_v55 = vpop.f32.mrb[0].mxu1 }
 0x14f   :  { %v197_v56 = vadd.f32 %v1553_v54, %v196_v55  ;;  %v1753_v57 = vpop.f32.mrb[1].mxu1 }
 0x150   :  { %v199_v58 = vpop.f32.mrb[2].mxu1 }
 0x151   :  { %v200_v59 = vadd.f32 %v1553_v54, %v199_v58  ;;  %v1754_v60 = vpop.f32.mrb[3].mxu1  ;;  %v203_v61 = vmax.f32 %v197_v56, 0.0  ;;  %v1902_v58 = vld [vmem:[#allocation10] ss:$8 sps:$4 sm:$0xff]  }
 0x152   :  { %v1905_v60 = vld [vmem:[#allocation10 + $0x10] ss:$8 sps:$4 sm:$0xff]  }
 0x153   :  { %v204_v62 = vmax.f32 %v200_v59, 0.0  ;;  %v1907_v59 = vld [vmem:[#allocation10 + $0x14] ss:$8 sps:$4 sm:$0xff]  }
 0x155   :  { %v205_v0 = vpack.c.bf16 %v204_v62, %v203_v61  ;;  %v1910_v61 = vld [vmem:[#allocation10 + $0x24] ss:$8 sps:$4 sm:$0xff]   ;;  %v1908_v62 = vld [vmem:[#allocation10 + $0x20] ss:$8 sps:$4 sm:$0xff]  }
 0x157   :  { %347 = vmatmul.mubr.bf16.vlgmr.msra.gmra.mrb[4].mxu1 %v205_v0  ;;  %v1911_v0 = vld [vmem:[#allocation10 + $0x30] ss:$8 sps:$4 sm:$0xff]  }
 0x158   :  { %813 = vmatpush1.bf16.msra.mxu1 %v1808_v63  ;;  %v1913_v63 = vld [vmem:[#allocation10 + $0x34] ss:$8 sps:$4 sm:$0xff]  }
 0x159   :  { %814 = vmatprep.subr.bf16.mxu1 %v1816_v1  ;;  %v1916_v1 = vld [vmem:[#allocation10 + $0x44] ss:$8 sps:$4 sm:$0xff]  }
 0x15c   :  { %815 = vmatpush1.bf16.msra.mxu1 %v1814_v2  ;;  %v1914_v2 = vld [vmem:[#allocation10 + $0x40] ss:$8 sps:$4 sm:$0xff]  }
 0x15d   :  { %816 = vmatprep.subr.bf16.mxu1 %v1822_v3  ;;  %v1919_v3 = vld [vmem:[#allocation10 + $0x54] ss:$8 sps:$4 sm:$0xff]  }
 0x160   :  { %817 = vmatpush1.bf16.msra.mxu1 %v1820_v4  ;;  %v1917_v4 = vld [vmem:[#allocation10 + $0x50] ss:$8 sps:$4 sm:$0xff]  }
 0x161   :  { %818 = vmatprep.subr.bf16.mxu1 %v1828_v5  ;;  %v1922_v5 = vld [vmem:[#allocation10 + $0x64] ss:$8 sps:$4 sm:$0xff]  }
 0x164   :  { %819 = vmatpush1.bf16.msra.mxu1 %v1826_v6  ;;  %v1920_v6 = vld [vmem:[#allocation10 + $0x60] ss:$8 sps:$4 sm:$0xff]  }
 0x165   :  { %820 = vmatprep.subr.bf16.mxu1 %v1834_v7  ;;  %v1925_v7 = vld [vmem:[#allocation10 + $0x74] ss:$8 sps:$4 sm:$0xff]  }
 0x168   :  { %821 = vmatpush1.bf16.msra.mxu1 %v1832_v8  ;;  %v1923_v8 = vld [vmem:[#allocation10 + $0x70] ss:$8 sps:$4 sm:$0xff]  }
 0x169   :  { %822 = vmatprep.subr.bf16.mxu1 %v1840_v9  ;;  %v1928_v9 = vld [vmem:[#allocation10 + $0x84] ss:$8 sps:$4 sm:$0xff]  }
 0x16c   :  { %823 = vmatpush1.bf16.msra.mxu1 %v1838_v10  ;;  %v1926_v10 = vld [vmem:[#allocation10 + $0x80] ss:$8 sps:$4 sm:$0xff]  }
 0x16d   :  { %824 = vmatprep.subr.bf16.mxu1 %v1846_v11  ;;  %v1931_v11 = vld [vmem:[#allocation10 + $0x94] ss:$8 sps:$4 sm:$0xff]  }
 0x170   :  { %825 = vmatpush1.bf16.msra.mxu1 %v1844_v12  ;;  %v1929_v12 = vld [vmem:[#allocation10 + $0x90] ss:$8 sps:$4 sm:$0xff]  }
 0x171   :  { %826 = vmatprep.subr.bf16.mxu1 %v1852_v13  ;;  %v1934_v13 = vld [vmem:[#allocation10 + $0xa4] ss:$8 sps:$4 sm:$0xff]  }
 0x174   :  { %827 = vmatpush1.bf16.msra.mxu1 %v1850_v14  ;;  %v1932_v14 = vld [vmem:[#allocation10 + $0xa0] ss:$8 sps:$4 sm:$0xff]  }
 0x175   :  { %828 = vmatprep.subr.bf16.mxu1 %v1858_v15  ;;  %v1937_v15 = vld [vmem:[#allocation10 + $0xb4] ss:$8 sps:$4 sm:$0xff]  }
 0x178   :  { %829 = vmatpush1.bf16.msra.mxu1 %v1856_v16  ;;  %v1935_v16 = vld [vmem:[#allocation10 + $0xb0] ss:$8 sps:$4 sm:$0xff]  }
 0x179   :  { %830 = vmatprep.subr.bf16.mxu1 %v1864_v17  ;;  %v1940_v17 = vld [vmem:[#allocation10 + $0xc4] ss:$8 sps:$4 sm:$0xff]  }
 0x17c   :  { %831 = vmatpush1.bf16.msra.mxu1 %v1862_v18  ;;  %v1938_v18 = vld [vmem:[#allocation10 + $0xc0] ss:$8 sps:$4 sm:$0xff]  }
 0x17d   :  { %832 = vmatprep.subr.bf16.mxu1 %v1870_v19  ;;  %v1943_v19 = vld [vmem:[#allocation10 + $0xd4] ss:$8 sps:$4 sm:$0xff]  }
 0x180   :  { %833 = vmatpush1.bf16.msra.mxu1 %v1868_v20  ;;  %v1941_v20 = vld [vmem:[#allocation10 + $0xd0] ss:$8 sps:$4 sm:$0xff]  }
 0x181   :  { %834 = vmatprep.subr.bf16.mxu1 %v1876_v21  ;;  %v1946_v21 = vld [vmem:[#allocation10 + $0xe4] ss:$8 sps:$4 sm:$0xff]  }
 0x184   :  { %835 = vmatpush1.bf16.msra.mxu1 %v1874_v22  ;;  %v1944_v22 = vld [vmem:[#allocation10 + $0xe0] ss:$8 sps:$4 sm:$0xff]  }
 0x185   :  { %836 = vmatprep.subr.bf16.mxu1 %v1882_v23  ;;  %v1949_v23 = vld [vmem:[#allocation10 + $0xf4] ss:$8 sps:$4 sm:$0xff]  }
 0x188   :  { %837 = vmatpush1.bf16.msra.mxu1 %v1880_v24  ;;  %v1947_v24 = vld [vmem:[#allocation10 + $0xf0] ss:$8 sps:$4 sm:$0xff]  }
 0x189   :  { %838 = vmatprep.subr.bf16.mxu1 %v1888_v25  ;;  %v1952_v25 = vld [vmem:[#allocation10 + $0x104] ss:$8 sps:$4 sm:$0xff]  }
 0x18c   :  { %839 = vmatpush1.bf16.msra.mxu1 %v1886_v26  ;;  %v1998_v26 = vld [vmem:[#allocation11 + $0x40] sm:$0xff]  }
 0x18d   :  { %840 = vmatprep.subr.bf16.mxu1 %v1894_v29  ;;  %v2001_v29 = vld [vmem:[#allocation11 + $0x8] sm:$0xff]  }
 0x190   :  { %841 = vmatpush1.bf16.msra.mxu1 %v1892_v30  ;;  %v2002_v30 = vld [vmem:[#allocation11 + $0x50] sm:$0xff]  }
 0x191   :  { %842 = vmatprep.subr.bf16.mxu1 %v1900_v33  ;;  %v2005_v33 = vld [vmem:[#allocation11 + $0x18] sm:$0xff]  }
 0x194   :  { %843 = vmatpush1.bf16.msra.mxu1 %v1898_v34  ;;  %v2006_v34 = vld [vmem:[#allocation11 + $0x60] sm:$0xff]  }
 0x195   :  { %1723 = vmatprep.subr.bf16.mxu1 %v1998_v26  ;;  %v1974_v26 = vld [vmem:[#allocation10 + $0x180] ss:$8 sps:$4 sm:$0xff]  }
 0x22a   :  { %v348_v44 = vpop.f32.mrb[4].mxu1 }
 0x22b   :  { %v349_v45 = vadd.f32 %v348_v44, %v227_v42  ;;  %v350_v46 = vpop.f32.mrb[5].mxu1  ;;  %v440_v44 = vrot.slane %v427_v40, %v439_v37  ;;  %v1994_v37 = vld [vmem:[#allocation10 + $0x1e4] ss:$8 sps:$4 sm:$0xff]  }
 0x22c   :  { %v351_v47 = vadd.f32 %v350_v46, %v231_v43  ;;  %v352_v48 = vpop.f32.mrb[6].mxu1 }
 0x22d   :  { %v353_v49 = vadd.f32 %v352_v48, %v227_v42  ;;  %v354_v50 = vpop.f32.mrb[7].mxu1  ;;  %v357_v52 = vmax.f32 %v349_v45, 0.0  ;;  %v443_v42 = vsub.s32 3, %v2344_v38  ;;  %v436_v45 = vrot.slane %v427_v40, %v2353_v41 }
 0x22e   :  { %v355_v51 = vadd.f32 %v354_v50, %v231_v43  ;;  %v358_v54 = vmax.f32 %v351_v47, 0.0  ;;  %v432_v43 = vrot.slane %v427_v40, %v2347_v39 }
 0x22f   :  { %v359_v53 = vmax.f32 %v353_v49, 0.0  ;;  %v444_v46 = vrot.slane %v427_v40, %v443_v42  ;;  %v1992_v40 = vld [vmem:[#allocation10 + $0x1e0] ss:$8 sps:$4 sm:$0xff]   ;;  %v1997_v42 = vld [vmem:[#allocation10 + $0x1f4] ss:$8 sps:$4 sm:$0xff]  }
 0x230   :  { %v360_v55 = vmax.f32 %v355_v51, 0.0 }
 0x231   :  { %v361_v56 = vpack.c.bf16 %v359_v53, %v357_v52 }
 0x232   :  { %v362_v57 = vpack.c.bf16 %v360_v55, %v358_v54 }
 0x234   :  { %801 = vmatprep.mubr.bf16.mxu0 %v362_v57  ;;  %844 = vmatprep.mubr.bf16.mxu1 %v362_v57 }
 0x235   :  { %802 = vmatmul.mubr.bf16.vlgmr.msra.gmra.mrb[0].mxu0 %v361_v56  ;;  %845 = vmatmul.mubr.bf16.vlgmr.msra.gmra.mrb[8].mxu1 %v361_v56 }
 0x236   :  { %1264 = vmatpush1.bf16.msra.mxu0 %v1902_v58  ;;  %1724 = vmatpush3.bf16.msra.mxu1 %v1999_v27  ;;  %v1979_v27 = vld [vmem:[#allocation10 + $0x194] ss:$8 sps:$4 sm:$0xff]  }
 0x237   :  { %1265 = vmatprep.subr.bf16.mxu0 %v1907_v59  ;;  %1725 = vmatprep.subr.bf16.mxu1 %v2000_v28  ;;  %v1977_v28 = vld [vmem:[#allocation10 + $0x190] ss:$8 sps:$4 sm:$0xff]  }
 0x23a   :  { %1266 = vmatpush1.bf16.msra.mxu0 %v1905_v60  ;;  %1726 = vmatpush3.bf16.msra.mxu1 %v2001_v29  ;;  %v1982_v29 = vld [vmem:[#allocation10 + $0x1a4] ss:$8 sps:$4 sm:$0xff]  }
 0x23b   :  { %1267 = vmatprep.subr.bf16.mxu0 %v1910_v61  ;;  %1727 = vmatprep.subr.bf16.mxu1 %v2002_v30  ;;  %v1980_v30 = vld [vmem:[#allocation10 + $0x1a0] ss:$8 sps:$4 sm:$0xff]  }
 0x23e   :  { %1268 = vmatpush1.bf16.msra.mxu0 %v1908_v62  ;;  %1728 = vmatpush3.bf16.msra.mxu1 %v2003_v31  ;;  %v1985_v31 = vld [vmem:[#allocation10 + $0x1b4] ss:$8 sps:$4 sm:$0xff]  }
 0x23f   :  { %1269 = vmatprep.subr.bf16.mxu0 %v1913_v63  ;;  %1729 = vmatprep.subr.bf16.mxu1 %v2004_v32  ;;  %v1983_v32 = vld [vmem:[#allocation10 + $0x1b0] ss:$8 sps:$4 sm:$0xff]  }
 0x242   :  { %1270 = vmatpush1.bf16.msra.mxu0 %v1911_v0  ;;  %1730 = vmatpush3.bf16.msra.mxu1 %v2005_v33  ;;  %v1988_v33 = vld [vmem:[#allocation10 + $0x1c4] ss:$8 sps:$4 sm:$0xff]  }
 0x243   :  { %1271 = vmatprep.subr.bf16.mxu0 %v1916_v1  ;;  %1731 = vmatprep.subr.bf16.mxu1 %v2006_v34  ;;  %v1986_v34 = vld [vmem:[#allocation10 + $0x1c0] ss:$8 sps:$4 sm:$0xff]  }
 0x246   :  { %1272 = vmatpush1.bf16.msra.mxu0 %v1914_v2  ;;  %1732 = vmatpush3.bf16.msra.mxu1 %v2007_v35  ;;  %v1991_v35 = vld [vmem:[#allocation10 + $0x1d4] ss:$8 sps:$4 sm:$0xff]  }
 0x247   :  { %1273 = vmatprep.subr.bf16.mxu0 %v1919_v3  ;;  %1733 = vmatprep.subr.bf16.mxu1 %v2008_v36  ;;  %v1989_v36 = vld [vmem:[#allocation10 + $0x1d0] ss:$8 sps:$4 sm:$0xff]  }
 0x24a   :  { %1274 = vmatpush1.bf16.msra.mxu0 %v1917_v4 }
 0x24b   :  { %1275 = vmatprep.subr.bf16.mxu0 %v1922_v5 }
 0x24e   :  { %1276 = vmatpush1.bf16.msra.mxu0 %v1920_v6 }
 0x24f   :  { %1277 = vmatprep.subr.bf16.mxu0 %v1925_v7 }
 0x252   :  { %1278 = vmatpush1.bf16.msra.mxu0 %v1923_v8 }
 0x253   :  { %1279 = vmatprep.subr.bf16.mxu0 %v1928_v9 }
 0x256   :  { %1280 = vmatpush1.bf16.msra.mxu0 %v1926_v10  ;;  %v1950_v10 = vld [vmem:[#allocation10 + $0x100] ss:$8 sps:$4 sm:$0xff]  }
 0x257   :  { %1281 = vmatprep.subr.bf16.mxu0 %v1931_v11  ;;  %v1955_v11 = vld [vmem:[#allocation10 + $0x114] ss:$8 sps:$4 sm:$0xff]  }
 0x25a   :  { %1282 = vmatpush1.bf16.msra.mxu0 %v1929_v12  ;;  %v1953_v12 = vld [vmem:[#allocation10 + $0x110] ss:$8 sps:$4 sm:$0xff]  }
 0x25b   :  { %1283 = vmatprep.subr.bf16.mxu0 %v1934_v13  ;;  %v1958_v13 = vld [vmem:[#allocation10 + $0x124] ss:$8 sps:$4 sm:$0xff]  }
 0x25e   :  { %1284 = vmatpush1.bf16.msra.mxu0 %v1932_v14  ;;  %v1956_v14 = vld [vmem:[#allocation10 + $0x120] ss:$8 sps:$4 sm:$0xff]  }
 0x25f   :  { %1285 = vmatprep.subr.bf16.mxu0 %v1937_v15  ;;  %v1961_v15 = vld [vmem:[#allocation10 + $0x134] ss:$8 sps:$4 sm:$0xff]  }
 0x262   :  { %1286 = vmatpush1.bf16.msra.mxu0 %v1935_v16  ;;  %v1959_v16 = vld [vmem:[#allocation10 + $0x130] ss:$8 sps:$4 sm:$0xff]  }
 0x263   :  { %1287 = vmatprep.subr.bf16.mxu0 %v1940_v17  ;;  %v1964_v17 = vld [vmem:[#allocation10 + $0x144] ss:$8 sps:$4 sm:$0xff]  }
 0x266   :  { %1288 = vmatpush1.bf16.msra.mxu0 %v1938_v18  ;;  %v1962_v18 = vld [vmem:[#allocation10 + $0x140] ss:$8 sps:$4 sm:$0xff]  }
 0x267   :  { %1289 = vmatprep.subr.bf16.mxu0 %v1943_v19  ;;  %v1967_v19 = vld [vmem:[#allocation10 + $0x154] ss:$8 sps:$4 sm:$0xff]  }
 0x26a   :  { %1290 = vmatpush1.bf16.msra.mxu0 %v1941_v20  ;;  %v1965_v20 = vld [vmem:[#allocation10 + $0x150] ss:$8 sps:$4 sm:$0xff]  }
 0x26b   :  { %1291 = vmatprep.subr.bf16.mxu0 %v1946_v21  ;;  %v1970_v21 = vld [vmem:[#allocation10 + $0x164] ss:$8 sps:$4 sm:$0xff]  }
 0x26e   :  { %1292 = vmatpush1.bf16.msra.mxu0 %v1944_v22  ;;  %v1968_v22 = vld [vmem:[#allocation10 + $0x160] ss:$8 sps:$4 sm:$0xff]  }
 0x26f   :  { %1293 = vmatprep.subr.bf16.mxu0 %v1949_v23  ;;  %v1973_v23 = vld [vmem:[#allocation10 + $0x174] ss:$8 sps:$4 sm:$0xff]  }
 0x272   :  { %1294 = vmatpush1.bf16.msra.mxu0 %v1947_v24  ;;  %v1971_v24 = vld [vmem:[#allocation10 + $0x170] ss:$8 sps:$4 sm:$0xff]  }
 0x273   :  { %1306 = vmatprep.subr.bf16.mxu0 %v1952_v25  ;;  %v1976_v25 = vld [vmem:[#allocation10 + $0x184] ss:$8 sps:$4 sm:$0xff]  }
 0x308   :  { %v803_v47 = vpop.f32.mrb[0].mxu0  ;;  %v846_v48 = vpop.f32.mrb[8].mxu1 }
 0x309   :  { %v804_v49 = vadd.f32 %v803_v47, %v432_v43  ;;  %v847_v50 = vadd.f32 %v846_v48, %v440_v44  ;;  %v805_v51 = vpop.f32.mrb[1].mxu0  ;;  %v848_v52 = vpop.f32.mrb[9].mxu1  ;;  %v2012_v47 = vld [vmem:[#allocation11 + $0x78] sm:$0xff]  }
 0x30a   :  { %v806_v53 = vadd.f32 %v805_v51, %v436_v45  ;;  %v849_v54 = vadd.f32 %v848_v52, %v444_v46  ;;  %v807_v55 = vpop.f32.mrb[2].mxu0  ;;  %v850_v56 = vpop.f32.mrb[10].mxu1  ;;  %v2013_v48 = vld [vmem:[#allocation11 + $0x38] sm:$0xff]  }
 0x30b   :  { %v808_v57 = vadd.f32 %v807_v55, %v432_v43  ;;  %v851_v58 = vadd.f32 %v850_v56, %v440_v44  ;;  %v809_v59 = vpop.f32.mrb[3].mxu0  ;;  %v852_v38 = vpop.f32.mrb[11].mxu1  ;;  %v855_v62 = vmax.f32 %v804_v49, 0.0  ;;  %v857_v63 = vmax.f32 %v847_v50, 0.0  ;;  %v1995_v43 = vld [vmem:[#allocation10 + $0x1f0] ss:$8 sps:$4 sm:$0xff]  }
 0x30c   :  { %v810_v60 = vadd.f32 %v809_v59, %v436_v45  ;;  %v853_v61 = vadd.f32 %v852_v38, %v444_v46  ;;  %v856_v2 = vmax.f32 %v806_v53, 0.0  ;;  %v858_v3 = vmax.f32 %v849_v54, 0.0  ;;  %v2009_v44 = vld [vmem:[#allocation11 + $0x28] sm:$0xff]   ;;  %v2010_v45 = vld [vmem:[#allocation11 + $0x70] sm:$0xff]   ;;  %v931_v49 = vld [vmem:[%s2398_s8] sm:$0x3] }
 0x30d   :  { %v859_v0 = vmax.f32 %v808_v57, 0.0  ;;  %v861_v1 = vmax.f32 %v851_v58, 0.0  ;;  %1734 = vmatpush3.bf16.msra.mxu1 %v2009_v44  ;;  %v2011_v46 = vld [vmem:[#allocation11 + $0x30] sm:$0xff]   ;;  %v936_v50 = vrot.slane %v931_v49, %v2347_v39  ;;  %v940_v51 = vrot.slane %v931_v49, %v2353_v41  ;;  %v1702_v39 = vld [vmem:[%s2400_s10] ss:$0 sm:$0xff] }
 0x30e   :  { %v860_v4 = vmax.f32 %v810_v60, 0.0  ;;  %v862_v5 = vmax.f32 %v853_v61, 0.0  ;;  %1735 = vmatprep.subr.bf16.mxu1 %v2010_v45 }
 0x30f   :  { %v863_v6 = vpack.c.bf16 %v859_v0, %v855_v62  ;;  %v2364_v7 = vpack.c.bf16 %v861_v1, %v857_v63 }
 0x310   :  { %v864_v8 = vpack.c.bf16 %v860_v4, %v856_v2  ;;  %v866_v9 = vpack.c.bf16 %v862_v5, %v858_v3 }
 0x311   :  { %1736 = vmatpush3.bf16.msra.mxu1 %v2011_v46 }
 0x312   :  { %1295 = vmatprep.mubr.bf16.mxu0 %v864_v8  ;;  %1737 = vmatprep.subr.bf16.mxu1 %v2012_v47 }
 0x313   :  { %1296 = vmatmul.mubr.bf16.vlgmr.msra.gmra.mrb[4].mxu0 %v863_v6 }
 0x314   :  { %1307 = vmatpush1.bf16.msra.mxu0 %v1950_v10  ;;  %1338 = vmatprep.mubr.bf16.mxu0 %v866_v9 }
 0x315   :  { %1308 = vmatprep.subr.bf16.mxu0 %v1955_v11  ;;  %1738 = vmatpush3.bf16.msra.mxu1 %v2013_v48 }
 0x318   :  { %1309 = vmatpush1.bf16.msra.mxu0 %v1953_v12 }
 0x319   :  { %1310 = vmatprep.subr.bf16.mxu0 %v1958_v13 }
 0x31c   :  { %1311 = vmatpush1.bf16.msra.mxu0 %v1956_v14 }
 0x31d   :  { %1312 = vmatprep.subr.bf16.mxu0 %v1961_v15 }
 0x320   :  { %1313 = vmatpush1.bf16.msra.mxu0 %v1959_v16 }
 0x321   :  { %1314 = vmatprep.subr.bf16.mxu0 %v1964_v17 }
 0x324   :  { %1315 = vmatpush1.bf16.msra.mxu0 %v1962_v18 }
 0x325   :  { %1316 = vmatprep.subr.bf16.mxu0 %v1967_v19 }
 0x328   :  { %1317 = vmatpush1.bf16.msra.mxu0 %v1965_v20 }
 0x329   :  { %1318 = vmatprep.subr.bf16.mxu0 %v1970_v21 }
 0x32c   :  { %1319 = vmatpush1.bf16.msra.mxu0 %v1968_v22 }
 0x32d   :  { %1320 = vmatprep.subr.bf16.mxu0 %v1973_v23 }
 0x330   :  { %1321 = vmatpush1.bf16.msra.mxu0 %v1971_v24 }
 0x331   :  { %1322 = vmatprep.subr.bf16.mxu0 %v1976_v25 }
 0x334   :  { %1323 = vmatpush1.bf16.msra.mxu0 %v1974_v26 }
 0x335   :  { %1324 = vmatprep.subr.bf16.mxu0 %v1979_v27 }
 0x338   :  { %1325 = vmatpush1.bf16.msra.mxu0 %v1977_v28 }
 0x339   :  { %1326 = vmatprep.subr.bf16.mxu0 %v1982_v29 }
 0x33c   :  { %1327 = vmatpush1.bf16.msra.mxu0 %v1980_v30 }
 0x33d   :  { %1328 = vmatprep.subr.bf16.mxu0 %v1985_v31 }
 0x340   :  { %1329 = vmatpush1.bf16.msra.mxu0 %v1983_v32 }
 0x341   :  { %1330 = vmatprep.subr.bf16.mxu0 %v1988_v33 }
 0x344   :  { %1331 = vmatpush1.bf16.msra.mxu0 %v1986_v34 }
 0x345   :  { %1332 = vmatprep.subr.bf16.mxu0 %v1991_v35 }
 0x348   :  { %1333 = vmatpush1.bf16.msra.mxu0 %v1989_v36 }
 0x349   :  { %1334 = vmatprep.subr.bf16.mxu0 %v1994_v37 }
 0x34c   :  { %1335 = vmatpush1.bf16.msra.mxu0 %v1992_v40 }
 0x34d   :  { %1336 = vmatprep.subr.bf16.mxu0 %v1997_v42 }
 0x350   :  { %1337 = vmatpush1.bf16.msra.mxu0 %v1995_v43 }
 0x353   :  { %1339 = vmatmul.mubr.bf16.vlgmr.msra.gmra.mrb[4].mxu0 %v2364_v7 }
 0x426   :  { %v1340_v52 = vpop.f32.mrb[4].mxu0 }
 0x427   :  { %v1755_v53 = vadd.f32 %v1340_v52, %v936_v50  ;;  %v1342_v54 = vpop.f32.mrb[5].mxu0 }
 0x428   :  { %v1756_v55 = vadd.f32 %v1342_v54, %v940_v51  ;;  %v1344_v56 = vpop.f32.mrb[6].mxu0 }
 0x429   :  { %v1757_v57 = vadd.f32 %v1344_v56, %v936_v50  ;;  %v1346_v58 = vpop.f32.mrb[7].mxu0  ;;  %v1349_v38 = vmax.f32 %v1755_v53, 0.0 }
 0x42a   :  { %v1758_v59 = vadd.f32 %v1346_v58, %v940_v51  ;;  %v1350_v61 = vmax.f32 %v1756_v55, 0.0 }
 0x42b   :  { %v1351_v60 = vmax.f32 %v1757_v57, 0.0 }
 0x42c   :  { %v1352_v62 = vmax.f32 %v1758_v59, 0.0 }
 0x42d   :  { %v1353_v63 = vpack.c.bf16 %v1351_v60, %v1349_v38 }
 0x42e   :  { %v1354_v0 = vpack.c.bf16 %v1352_v62, %v1350_v61 }
 0x430   :  { %1522 = vmatprep.mubr.bf16.mxu1 %v1354_v0 }
 0x431   :  { %1523 = vmatmul.mubr.bf16.vlgmr.msra.gmra.mrb[12].mxu1 %v1353_v63 }
 0x504   :  { %v1739_v1 = vpop.f32.mrb[12].mxu1 }
 0x505   :  { %v1740_v41 = vpop.f32.mrb[13].mxu1 }
 0x506   :  { %v1741_v2 = vadd.f32 %v1740_v41, %v1739_v1  ;;  %v1742_v3 = vpop.f32.mrb[14].mxu1 }
 0x507   :  { %v1743_v4 = vpop.f32.mrb[15].mxu1 }
 0x508   :  { %v1525_v5 = vadd.f32 %v1741_v2, %v1702_v39  ;;  %v1744_v6 = vadd.f32 %v1743_v4, %v1742_v3 }
 0x50a   :  { %1531 = vst [vmem:[#allocation13] sm:$0xff] %v1525_v5  ;;  %v1528_v7 = vadd.f32 %v1744_v6, %v1702_v39 }
 0x50c   :  { %1532 = vst [vmem:[#allocation13 + $0x8] sm:$0xff] %v1528_v7 }
 0x50d   :  { %2157 = shalt.err (!%p2154_p10)
}
 0x50e   :  { %s2158_s1 = scalar_lea.hbm %s2401_s11, 256 }
 0x50f   :  { %p2159_p11 = scmp.ne.s32.totalorder %s2401_s11, %s2158_s1  ;;  %p2162_p12 = scmp.lt.u32.totalorder %s2158_s1, %s2401_s11 }
 0x511   :  { %p2164_p13 = pnand %p2162_p12, %p2159_p11 }
 0x513   :  { %2167 = shalt.err (!%p2164_p13)
}
 0x514   :  { %1544 = dma.vmem_to_hbm [thread:$0]  %s1539_s24, 256, %s2401_s11, [#allocation4], %s2185_s5, %s2185_s5, %s2186_s13  }
 0x515   :  { %2176 = dma.done.wait [#allocation4], 256  }
 0x516   :  { %2177 = vsyncadd [#allocation4], 4294967040 }
 0x517   :  { %1548 = vsyncpa [#allocation3], 1 }
 0x518   :  { %1549 = vsyncpa [#allocation6], 1 }
 0x519   :  { %1550 = vsyncpa [#allocation9], 1 }
 0x51a   :  { %1551 = vsyncpa [#allocation12], 1 }
 0x51b   :  { %1552 = vsyncpa [#allocation4], 1 }

</bundles_post_ra>
